<compile_context>
chip_gen: v6e
topology: v6e:2x2x1
jax: 0.10.0
libtpu: 0.0.40
codegen_flags: <defaults>
</compile_context>

<pallas_src>
import functools

import jax
import jax.numpy as jnp
from jax.experimental import pallas as pl
from jax.experimental.pallas import tpu as pltpu


def _round_up(x: int, m: int) -> int:
    return ((x + m - 1) // m) * m


# ----------------------------------------------------------------------------
# Pallas kernel: fused 1x1 conv (channel matmul) + ReLU
# ----------------------------------------------------------------------------
def _conv1x1_relu_kernel(x_ref, w_ref, o_ref):
    # x_ref: (TN, Kp)  spectral features (lane-dense, zero padded)
    # w_ref: (Kp, Op)  permuted + zero padded conv weight
    # o_ref: (TN, Op)  f32 output
    y = jnp.dot(x_ref[...], w_ref[...], preferred_element_type=jnp.float32)
    o_ref[...] = jnp.maximum(y, 0.0).astype(o_ref.dtype)


def conv1x1_relu(x_mat: jax.Array, w_mat: jax.Array, *, tn: int = 512,
                 out_dtype=jnp.float32) -> jax.Array:
    """y = relu(x_mat @ w_mat), rows tiled by a Pallas TPU kernel.

    x_mat: (N, Kp)   Kp a multiple of 128 (lane-dense).
    w_mat: (Kp, Op)  Op a multiple of 128 (lane-dense, VMEM resident).
    Returns (N, Op) in out_dtype (f32 accumulation on the MXU).
    """
    N, K = x_mat.shape
    Kw, O = w_mat.shape
    assert Kw == K, (Kw, K)

    # Single exact tile for small N; otherwise tn rows per grid step.  No
    # jnp.pad copy of x_mat -- a ragged last tile is handled by Pallas and the
    # extra rows are sliced off below.
    tn_eff = min(tn, _round_up(N, 8))
    n_tiles = pl.cdiv(N, tn_eff)
    n_rows = n_tiles * tn_eff

    in_bytes = jnp.dtype(x_mat.dtype).itemsize
    out_bytes = jnp.dtype(out_dtype).itemsize

    # Double-buffered x tile + out tile, weight resident, plus slack.
    vmem_needed = (2 * tn_eff * K * in_bytes
                   + 2 * tn_eff * O * out_bytes
                   + 2 * K * O * in_bytes
                   + (2 << 20))
    # Cap at 64 MiB so the same setting is valid on v7x (64 MiB physical VMEM).
    vmem_limit = int(min(max(vmem_needed, 8 << 20), 64 << 20))

    cost = pl.CostEstimate(
        flops=int(2 * N * K * O),
        transcendentals=0,
        bytes_accessed=int(N * K * in_bytes + K * O * in_bytes
                           + N * O * out_bytes),
    )

    out = pl.pallas_call(
        _conv1x1_relu_kernel,
        out_shape=jax.ShapeDtypeStruct((n_rows, O), out_dtype),
        grid_spec=pltpu.PrefetchScalarGridSpec(
            num_scalar_prefetch=0,
            grid=(n_tiles,),
            in_specs=[
                pl.BlockSpec((tn_eff, K), lambda i: (i, 0)),   # row tile
                # Constant-index weight block: the pipeline keeps it resident
                # across grid steps (no per-step re-fetch).
                pl.BlockSpec((K, O), lambda i: (0, 0)),
            ],
            out_specs=pl.BlockSpec((tn_eff, O), lambda i: (i, 0)),
        ),
        compiler_params=pltpu.CompilerParams(
            dimension_semantics=("parallel",),   # v7x: shard rows over 2 TCs
            vmem_limit_bytes=vmem_limit,
        ),
        cost_estimate=cost,
    )(x_mat, w_mat)
    return out[:N] if n_rows != N else out


# ----------------------------------------------------------------------------
# FourierUnit forward (defaults: groups=1, no SE, no pos-encoding, 2D FFT,
# fft_norm='ortho', no spatial rescale)
# ----------------------------------------------------------------------------
def fourier_unit_forward(x: jax.Array, conv_weight: jax.Array,
                         fft_norm: str = "ortho", *, tn: int = 512,
                         compute_dtype=jnp.float32) -> jax.Array:
    """x: (B, C_in, H, W).  conv_weight: (2*C_out, 2*C_in, 1, 1), no bias."""
    B, C, H, W = x.shape
    O2 = conv_weight.shape[0]
    Cout = O2 // 2
    K = 2 * C
    Kp = _round_up(K, 128)
    Op = _round_up(O2, 128)

    # NCHW -> NHWC once: channels stay on the lane axis from here on.
    x_nhwc = jnp.transpose(x.astype(jnp.float32), (0, 2, 3, 1))       # (B,H,W,C)

    # rfft2 over the spatial axes, norm='ortho' -> (B, H, Wf, C) complex.
    ffted = jnp.fft.rfft2(x_nhwc, axes=(1, 2), norm=fft_norm)
    Wf = ffted.shape[2]
    N = B * H * Wf

    # Spectral features, concatenated [real..., imag...] on the lane axis and
    # zero-padded to a lane-dense multiple of 128 in a single concat.
    parts = [ffted.real.astype(compute_dtype), ffted.imag.astype(compute_dtype)]
    if Kp > K:
        parts.append(jnp.zeros((B, H, Wf, Kp - K), compute_dtype))
    x_mat = jnp.concatenate(parts, axis=-1).reshape(N, Kp)

    # Conv weight: PyTorch uses interleaved [c0_re, c0_im, c1_re, ...] channel
    # order on both axes; permute once (O(K*O)) to the concatenated order used
    # above, then zero-pad rows/cols to (Kp, Op).
    w = conv_weight[:, :, 0, 0].astype(jnp.float32)                   # (2Cout, 2C)
    perm_in = jnp.concatenate([2 * jnp.arange(C), 2 * jnp.arange(C) + 1])
    perm_out = jnp.concatenate([2 * jnp.arange(Cout), 2 * jnp.arange(Cout) + 1])
    w_t = w.T[perm_in][:, perm_out]                                   # (2C, 2Cout)
    w_pad = jnp.zeros((Kp, Op), compute_dtype).at[:K, :O2].set(
        w_t.astype(compute_dtype))

    # Hot path: fused 1x1 conv + ReLU on the MXU (Pallas).
    y_mat = conv1x1_relu(x_mat, w_pad, tn=tn, out_dtype=jnp.float32)  # (N, Op)

    # Drop padded lanes, rebuild complex spectrum, invert, back to NCHW.
    y = y_mat.reshape(B, H, Wf, Op)
    y_c = jax.lax.complex(y[..., :Cout], y[..., Cout:2 * Cout])       # (B,H,Wf,Cout)
    out_nhwc = jnp.fft.irfft2(y_c, s=(H, W), axes=(1, 2), norm=fft_norm)
    return jnp.transpose(out_nhwc, (0, 3, 1, 2)).astype(x.dtype)      # (B,Cout,H,W)


# ----------------------------------------------------------------------------
# Pure-JAX reference (PyTorch-faithful math, no Pallas) for a sanity check
# ----------------------------------------------------------------------------
def _reference_forward(x, conv_weight, fft_norm="ortho"):
    B, C, H, W = x.shape
    ffted = jnp.fft.rfft2(x, axes=(-2, -1), norm=fft_norm)
    Wf = ffted.shape[-1]
    s = jnp.stack((ffted.real, ffted.imag), axis=-1)
    s = jnp.transpose(s, (0, 1, 4, 2, 3)).reshape(B, 2 * C, H, Wf)
    w = conv_weight[:, :, 0, 0]                                        # (2Cout, 2C)
    y = jnp.einsum("oc,bchw->bohw", w, s)
    y = jnp.maximum(y, 0.0)
    Cout = w.shape[0] // 2
    y = y.reshape(B, Cout, 2, H, Wf)
    y = jnp.transpose(y, (0, 1, 3, 4, 2))
    y_c = y[..., 0] + 1j * y[..., 1]
    return jnp.fft.irfft2(y_c, s=(H, W), axes=(-2, -1), norm=fft_norm)


# ----------------------------------------------------------------------------
if __name__ == "__main__":
    B, C_in, C_out, H, W = 2, 4, 4, 16, 16

    key = jax.random.PRNGKey(0)
    kx, kw = jax.random.split(key)

    x = jax.random.normal(kx, (B, C_in, H, W), dtype=jnp.float32)
    # Conv2d(in=2*C_in, out=2*C_out, kernel=1, bias=False) weight, deterministic.
    fan_in = 2 * C_in
    conv_weight = jax.random.uniform(
        kw, (2 * C_out, 2 * C_in, 1, 1), dtype=jnp.float32,
        minval=-1.0 / jnp.sqrt(fan_in), maxval=1.0 / jnp.sqrt(fan_in))

    ref = _reference_forward(x, conv_weight)

    # f32 compute path: must match the reference tightly.
    fwd_f32 = jax.jit(functools.partial(
        fourier_unit_forward, fft_norm="ortho", compute_dtype=jnp.float32))
    out_f32 = jax.block_until_ready(fwd_f32(x, conv_weight))
    assert out_f32.shape == (B, C_out, H, W), out_f32.shape
    assert jnp.allclose(out_f32, ref, atol=1e-4, rtol=1e-4), \
        float(jnp.max(jnp.abs(out_f32 - ref)))

    # bf16 matmul inputs (f32 accumulation / f32 output): halves HBM/VMEM
    # traffic on v6e/v7x; checked with a loose tolerance vs the f32 reference.
    fwd_bf16 = jax.jit(functools.partial(
        fourier_unit_forward, fft_norm="ortho", compute_dtype=jnp.bfloat16))
    out_bf16 = jax.block_until_ready(fwd_bf16(x, conv_weight))
    assert out_bf16.shape == (B, C_out, H, W), out_bf16.shape
    assert jnp.allclose(out_bf16, ref, atol=2e-1, rtol=1e-1), \
        float(jnp.max(jnp.abs(out_bf16 - ref)))

    print("KERNEL_OK")
</pallas_src>

<mosaic_0001>
module attributes {stable_mosaic.version = 11 : i64} {
  func.func @_conv1x1_relu_kernel(%arg0: i32, %arg1: memref<288x128xf32, #tpu.memory_space<vmem>>, %arg2: memref<128x128xf32, #tpu.memory_space<vmem>>, %arg3: memref<288x128xf32, #tpu.memory_space<vmem>>) attributes {dimension_semantics = [#tpu.dimension_semantics<parallel>], iteration_bounds = array<i64: 1>, scalar_prefetch = 0 : i64, scratch_operands = 0 : i64, tpu.core_type = #tpu.core_type<tc>, window_params = [{transform_indices = @transform_0, window_bounds = array<i64: 288, 128>}, {pipeline_mode = #tpu.pipeline_mode<synchronous>, transform_indices = @transform_1, window_bounds = array<i64: 128, 128>}, {transform_indices = @transform_2, window_bounds = array<i64: 288, 128>}]} {
    %c0 = arith.constant 0 : index
    %c0_0 = arith.constant 0 : index
    %0 = vector.load %arg1[%c0, %c0_0] : memref<288x128xf32, #tpu.memory_space<vmem>>, vector<288x128xf32>
    %c0_1 = arith.constant 0 : index
    %c0_2 = arith.constant 0 : index
    %1 = vector.load %arg2[%c0_1, %c0_2] : memref<128x128xf32, #tpu.memory_space<vmem>>, vector<128x128xf32>
    %cst = arith.constant dense<0.000000e+00> : vector<288x128xf32>
    %2 = tpu.matmul %0, %1, %cst {dimension_numbers = #tpu.dot_dimension_numbers<[1], [0], [0], [1], [0, 0, 1, 1], [], []>} : vector<288x128xf32>, vector<128x128xf32>, vector<288x128xf32> -> vector<288x128xf32>
    %cst_3 = arith.constant 0.000000e+00 : f32
    %3 = vector.broadcast %cst_3 : f32 to vector<288x128xf32>
    %4 = arith.maximumf %2, %3 : vector<288x128xf32>
    %c0_4 = arith.constant 0 : index
    %c0_5 = arith.constant 0 : index
    %5 = vector.load %arg3[%c0_4, %c0_5] : memref<288x128xf32, #tpu.memory_space<vmem>>, vector<288x128xf32>
    tpu.vector_store %arg3[%c0_4, %c0_5], %4 {strides = array<i32>} : memref<288x128xf32, #tpu.memory_space<vmem>>, vector<288x128xf32>,
    return
  }
  func.func @transform_0(%arg0: i32) -> (i32, i32) {
    %c0_i32 = arith.constant 0 : i32
    %c0_i32_0 = arith.constant 0 : i32
    return %arg0, %c0_i32 : i32, i32
  }
  func.func @transform_1(%arg0: i32) -> (i32, i32) {
    %c0_i32 = arith.constant 0 : i32
    %c0_i32_0 = arith.constant 0 : i32
    %c0_i32_1 = arith.constant 0 : i32
    return %c0_i32, %c0_i32_0 : i32, i32
  }
  func.func @transform_2(%arg0: i32) -> (i32, i32) {
    %c0_i32 = arith.constant 0 : i32
    %c0_i32_0 = arith.constant 0 : i32
    return %arg0, %c0_i32 : i32, i32
  }
}

</mosaic_0001>

<bundles_post_ra>
// kernel: fourier_unit_forward.1
= control target key start
LH: loop header
LB: loop body
LE: loop exit
PB: predicated region body
PF: predicated region fallthrough
CT: control target
= control target key end

     0   :  { %s833_s1 = inlined_call_operand.vmem [shape: f32[128,128], index: 1, kind: input, shape index: {}]   ;;  %s834_s0 = inlined_call_operand.vmem [shape: f32[288,128], index: 0, kind: input, shape index: {}]   ;;  %s835_s2 = inlined_call_operand.vmem [shape: f32[288,128], index: 2, kind: output, shape index: {}]  }
   0x1   :  { %v62_v0 = vld [vmem:[%s833_s1 + $0x78] sm:$0xff]  ;;  %v61_v1 = vld [vmem:[%s833_s1 + $0x70] sm:$0xff]  ;;  %v60_v2 = vld [vmem:[%s833_s1 + $0x68] sm:$0xff] }
   0x2   :  { %436 = vmatprep.subr.mxu0 %v62_v0  ;;  %522 = vmatprep.subr.mxu1 %v62_v0  ;;  %v59_v3 = vld [vmem:[%s833_s1 + $0x60] sm:$0xff]  ;;  %v58_v4 = vld [vmem:[%s833_s1 + $0x58] sm:$0xff]  ;;  %v57_v5 = vld [vmem:[%s833_s1 + $0x50] sm:$0xff] }
   0x3   :  { %437 = vmatpush3.msra.mxu0 %v62_v0  ;;  %538 = vmatpush3.msra.mxu1 %v62_v0  ;;  %v56_v6 = vld [vmem:[%s833_s1 + $0x48] sm:$0xff]  ;;  %v55_v7 = vld [vmem:[%s833_s1 + $0x40] sm:$0xff]  ;;  %v54_v8 = vld [vmem:[%s833_s1 + $0x38] sm:$0xff] }
   0x4   :  { %438 = vmatprep.subr.mxu0 %v61_v1  ;;  %523 = vmatprep.subr.mxu1 %v61_v1  ;;  %v53_v9 = vld [vmem:[%s833_s1 + $0x30] sm:$0xff]  ;;  %v52_v10 = vld [vmem:[%s833_s1 + $0x28] sm:$0xff]  ;;  %v51_v11 = vld [vmem:[%s833_s1 + $0x20] sm:$0xff] }
   0x5   :  { %439 = vmatpush3.msra.mxu0 %v61_v1  ;;  %539 = vmatpush3.msra.mxu1 %v61_v1  ;;  %v50_v12 = vld [vmem:[%s833_s1 + $0x18] sm:$0xff]  ;;  %v49_v13 = vld [vmem:[%s833_s1 + $0x10] sm:$0xff]  ;;  %v48_v14 = vld [vmem:[%s833_s1 + $0x8] sm:$0xff] }
   0x6   :  { %440 = vmatprep.subr.mxu0 %v60_v2  ;;  %524 = vmatprep.subr.mxu1 %v60_v2  ;;  %v47_v15 = vld [vmem:[%s833_s1] sm:$0xff]  ;;  %v29_v17 = vld [vmem:[%s834_s0 + $0x90] sm:$0xff]  ;;  %v12_v18 = vld [vmem:[%s834_s0 + $0x8] sm:$0xff] }
   0x7   :  { %441 = vmatpush3.msra.mxu0 %v60_v2  ;;  %540 = vmatpush3.msra.mxu1 %v60_v2  ;;  %v11_v16 = vld [vmem:[%s834_s0] sm:$0xff]  ;;  %v30_v19 = vld [vmem:[%s834_s0 + $0x98] sm:$0xff]  ;;  %v13_v20 = vld [vmem:[%s834_s0 + $0x10] sm:$0xff] }
   0x8   :  { %442 = vmatprep.subr.mxu0 %v59_v3  ;;  %525 = vmatprep.subr.mxu1 %v59_v3  ;;  %v31_v21 = vld [vmem:[%s834_s0 + $0xa0] sm:$0xff]  ;;  %v14_v22 = vld [vmem:[%s834_s0 + $0x18] sm:$0xff]  ;;  %v32_v23 = vld [vmem:[%s834_s0 + $0xa8] sm:$0xff] }
   0x9   :  { %443 = vmatpush3.msra.mxu0 %v59_v3  ;;  %541 = vmatpush3.msra.mxu1 %v59_v3  ;;  %v15_v24 = vld [vmem:[%s834_s0 + $0x20] sm:$0xff]  ;;  %v33_v25 = vld [vmem:[%s834_s0 + $0xb0] sm:$0xff]  ;;  %v16_v26 = vld [vmem:[%s834_s0 + $0x28] sm:$0xff] }
   0xa   :  { %444 = vmatprep.subr.mxu0 %v58_v4  ;;  %526 = vmatprep.subr.mxu1 %v58_v4  ;;  %v34_v27 = vld [vmem:[%s834_s0 + $0xb8] sm:$0xff]  ;;  %v17_v28 = vld [vmem:[%s834_s0 + $0x30] sm:$0xff]  ;;  %v35_v29 = vld [vmem:[%s834_s0 + $0xc0] sm:$0xff] }
   0xb   :  { %445 = vmatpush3.msra.mxu0 %v58_v4  ;;  %542 = vmatpush3.msra.mxu1 %v58_v4  ;;  %v18_v30 = vld [vmem:[%s834_s0 + $0x38] sm:$0xff]  ;;  %v36_v31 = vld [vmem:[%s834_s0 + $0xc8] sm:$0xff]  ;;  %v19_v32 = vld [vmem:[%s834_s0 + $0x40] sm:$0xff] }
   0xc   :  { %446 = vmatprep.subr.mxu0 %v57_v5  ;;  %527 = vmatprep.subr.mxu1 %v57_v5  ;;  %v37_v33 = vld [vmem:[%s834_s0 + $0xd0] sm:$0xff]  ;;  %v20_v34 = vld [vmem:[%s834_s0 + $0x48] sm:$0xff]  ;;  %v38_v35 = vld [vmem:[%s834_s0 + $0xd8] sm:$0xff] }
   0xd   :  { %447 = vmatpush3.msra.mxu0 %v57_v5  ;;  %543 = vmatpush3.msra.mxu1 %v57_v5  ;;  %v21_v36 = vld [vmem:[%s834_s0 + $0x50] sm:$0xff]  ;;  %v39_v37 = vld [vmem:[%s834_s0 + $0xe0] sm:$0xff]  ;;  %v22_v38 = vld [vmem:[%s834_s0 + $0x58] sm:$0xff] }
   0xe   :  { %448 = vmatprep.subr.mxu0 %v56_v6  ;;  %528 = vmatprep.subr.mxu1 %v56_v6  ;;  %v40_v39 = vld [vmem:[%s834_s0 + $0xe8] sm:$0xff]  ;;  %v23_v40 = vld [vmem:[%s834_s0 + $0x60] sm:$0xff]  ;;  %v41_v41 = vld [vmem:[%s834_s0 + $0xf0] sm:$0xff] }
   0xf   :  { %449 = vmatpush3.msra.mxu0 %v56_v6  ;;  %544 = vmatpush3.msra.mxu1 %v56_v6  ;;  %v24_v42 = vld [vmem:[%s834_s0 + $0x68] sm:$0xff]  ;;  %v42_v43 = vld [vmem:[%s834_s0 + $0xf8] sm:$0xff]  ;;  %v25_v44 = vld [vmem:[%s834_s0 + $0x70] sm:$0xff] }
  0x10   :  { %450 = vmatprep.subr.mxu0 %v55_v7  ;;  %529 = vmatprep.subr.mxu1 %v55_v7  ;;  %v43_v45 = vld [vmem:[%s834_s0 + $0x100] sm:$0xff]  ;;  %v26_v46 = vld [vmem:[%s834_s0 + $0x78] sm:$0xff]  ;;  %v44_v47 = vld [vmem:[%s834_s0 + $0x108] sm:$0xff] }
  0x11   :  { %451 = vmatpush3.msra.mxu0 %v55_v7  ;;  %545 = vmatpush3.msra.mxu1 %v55_v7  ;;  %v27_v48 = vld [vmem:[%s834_s0 + $0x80] sm:$0xff]  ;;  %v45_v49 = vld [vmem:[%s834_s0 + $0x110] sm:$0xff]  ;;  %v28_v50 = vld [vmem:[%s834_s0 + $0x88] sm:$0xff] }
  0x12   :  { %452 = vmatprep.subr.mxu0 %v54_v8  ;;  %530 = vmatprep.subr.mxu1 %v54_v8  ;;  %v46_v51 = vld [vmem:[%s834_s0 + $0x118] sm:$0xff] }
  0x13   :  { %453 = vmatpush3.msra.mxu0 %v54_v8  ;;  %546 = vmatpush3.msra.mxu1 %v54_v8 }
  0x14   :  { %454 = vmatprep.subr.mxu0 %v53_v9  ;;  %531 = vmatprep.subr.mxu1 %v53_v9 }
  0x15   :  { %455 = vmatpush3.msra.mxu0 %v53_v9  ;;  %547 = vmatpush3.msra.mxu1 %v53_v9 }
  0x16   :  { %456 = vmatprep.subr.mxu0 %v52_v10  ;;  %532 = vmatprep.subr.mxu1 %v52_v10 }
  0x17   :  { %457 = vmatpush3.msra.mxu0 %v52_v10  ;;  %548 = vmatpush3.msra.mxu1 %v52_v10 }
  0x18   :  { %458 = vmatprep.subr.mxu0 %v51_v11  ;;  %533 = vmatprep.subr.mxu1 %v51_v11 }
  0x19   :  { %459 = vmatpush3.msra.mxu0 %v51_v11  ;;  %549 = vmatpush3.msra.mxu1 %v51_v11 }
  0x1a   :  { %460 = vmatprep.subr.mxu0 %v50_v12  ;;  %534 = vmatprep.subr.mxu1 %v50_v12 }
  0x1b   :  { %461 = vmatpush3.msra.mxu0 %v50_v12  ;;  %550 = vmatpush3.msra.mxu1 %v50_v12 }
  0x1c   :  { %462 = vmatprep.subr.mxu0 %v49_v13  ;;  %535 = vmatprep.subr.mxu1 %v49_v13 }
  0x1d   :  { %463 = vmatpush3.msra.mxu0 %v49_v13  ;;  %551 = vmatpush3.msra.mxu1 %v49_v13 }
  0x1e   :  { %464 = vmatprep.subr.mxu0 %v48_v14  ;;  %536 = vmatprep.subr.mxu1 %v48_v14 }
  0x1f   :  { %465 = vmatpush3.msra.mxu0 %v48_v14  ;;  %552 = vmatpush3.msra.mxu1 %v48_v14 }
  0x20   :  { %466 = vmatprep.subr.mxu0 %v47_v15  ;;  %537 = vmatprep.subr.mxu1 %v47_v15 }
  0x21   :  { %467 = vmatpush3.msra.mxu0 %v47_v15  ;;  %553 = vmatpush3.msra.mxu1 %v47_v15 }
  0x22   :  { %468 = vmatprep.mubr.f32.mxu0 %v11_v16  ;;  %495 = vmatprep.mubr.f32.mxu1 %v29_v17 }
  0x23   :  { %469 = vmatmul.mubr.f32.vlgmr.msra.gmra.mxu0 %v12_v18  ;;  %496 = vmatmul.mubr.f32.vlgmr.msra.gmra.mxu1 %v30_v19 }
  0x24   :  { %471 = vmatprep.mubr.f32.mxu0 %v13_v20  ;;  %498 = vmatprep.mubr.f32.mxu1 %v31_v21 }
  0x27   :  { %472 = vmatmul.mubr.f32.gmra.mxu0 %v14_v22  ;;  %499 = vmatmul.mubr.f32.gmra.mxu1 %v32_v23 }
  0x28   :  { %474 = vmatprep.mubr.f32.mxu0 %v15_v24  ;;  %501 = vmatprep.mubr.f32.mxu1 %v33_v25 }
  0x2b   :  { %475 = vmatmul.mubr.f32.gmra.mxu0 %v16_v26  ;;  %502 = vmatmul.mubr.f32.gmra.mxu1 %v34_v27 }
  0x2c   :  { %477 = vmatprep.mubr.f32.mxu0 %v17_v28  ;;  %504 = vmatprep.mubr.f32.mxu1 %v35_v29 }
  0x2f   :  { %478 = vmatmul.mubr.f32.gmra.mxu0 %v18_v30  ;;  %505 = vmatmul.mubr.f32.gmra.mxu1 %v36_v31 }
  0x30   :  { %480 = vmatprep.mubr.f32.mxu0 %v19_v32  ;;  %507 = vmatprep.mubr.f32.mxu1 %v37_v33 }
  0x33   :  { %481 = vmatmul.mubr.f32.gmra.mxu0 %v20_v34  ;;  %508 = vmatmul.mubr.f32.gmra.mxu1 %v38_v35 }
  0x34   :  { %483 = vmatprep.mubr.f32.mxu0 %v21_v36  ;;  %510 = vmatprep.mubr.f32.mxu1 %v39_v37 }
  0x37   :  { %484 = vmatmul.mubr.f32.gmra.mxu0 %v22_v38  ;;  %511 = vmatmul.mubr.f32.gmra.mxu1 %v40_v39 }
  0x38   :  { %486 = vmatprep.mubr.f32.mxu0 %v23_v40  ;;  %513 = vmatprep.mubr.f32.mxu1 %v41_v41 }
  0x3b   :  { %487 = vmatmul.mubr.f32.gmra.mxu0 %v24_v42  ;;  %514 = vmatmul.mubr.f32.gmra.mxu1 %v42_v43 }
  0x3c   :  { %489 = vmatprep.mubr.f32.mxu0 %v25_v44  ;;  %516 = vmatprep.mubr.f32.mxu1 %v43_v45 }
  0x3f   :  { %490 = vmatmul.mubr.f32.gmra.mxu0 %v26_v46  ;;  %517 = vmatmul.mubr.f32.gmra.mxu1 %v44_v47 }
  0x40   :  { %492 = vmatprep.mubr.f32.mxu0 %v27_v48  ;;  %519 = vmatprep.mubr.f32.mxu1 %v45_v49 }
  0x43   :  { %493 = vmatmul.mubr.f32.gmra.mxu0 %v28_v50  ;;  %520 = vmatmul.mubr.f32.gmra.mxu1 %v46_v51 }
  0xe3   :  { %v470_v52 = vpop.f32.mrf.mxu0  ;;  %v497_v53 = vpop.f32.mrf.mxu1 }
  0xe4   :  { %v309_v54 = vmax.f32 %v470_v52, 0.0  ;;  %v327_v55 = vmax.f32 %v497_v53, 0.0 }
  0xe5   :  { %v129_v56 = vpop.f32.mrf.mxu0  ;;  %v219_v57 = vpop.f32.mrf.mxu1 }
  0xe6   :  { %345 = vst [vmem:[%s835_s2 + $0x8] sm:$0xff] %v309_v54  ;;  %363 = vst [vmem:[%s835_s2 + $0x98] sm:$0xff] %v327_v55  ;;  %v308_v58 = vmax.f32 %v129_v56, 0.0  ;;  %v326_v59 = vmax.f32 %v219_v57, 0.0 }
  0xe7   :  { %v473_v60 = vpop.f32.mrf.mxu0  ;;  %v500_v61 = vpop.f32.mrf.mxu1 }
  0xe8   :  { %344 = vst [vmem:[%s835_s2] sm:$0xff] %v308_v58  ;;  %362 = vst [vmem:[%s835_s2 + $0x90] sm:$0xff] %v326_v59  ;;  %v311_v62 = vmax.f32 %v473_v60, 0.0  ;;  %v329_v63 = vmax.f32 %v500_v61, 0.0 }
  0xe9   :  { %v139_v0 = vpop.f32.mrf.mxu0  ;;  %v229_v1 = vpop.f32.mrf.mxu1 }
  0xea   :  { %347 = vst [vmem:[%s835_s2 + $0x18] sm:$0xff] %v311_v62  ;;  %365 = vst [vmem:[%s835_s2 + $0xa8] sm:$0xff] %v329_v63  ;;  %v310_v2 = vmax.f32 %v139_v0, 0.0  ;;  %v328_v3 = vmax.f32 %v229_v1, 0.0 }
  0xeb   :  { %v476_v4 = vpop.f32.mrf.mxu0  ;;  %v503_v5 = vpop.f32.mrf.mxu1 }
  0xec   :  { %346 = vst [vmem:[%s835_s2 + $0x10] sm:$0xff] %v310_v2  ;;  %364 = vst [vmem:[%s835_s2 + $0xa0] sm:$0xff] %v328_v3  ;;  %v313_v6 = vmax.f32 %v476_v4, 0.0  ;;  %v331_v7 = vmax.f32 %v503_v5, 0.0 }
  0xed   :  { %v149_v8 = vpop.f32.mrf.mxu0  ;;  %v239_v9 = vpop.f32.mrf.mxu1 }
  0xee   :  { %349 = vst [vmem:[%s835_s2 + $0x28] sm:$0xff] %v313_v6  ;;  %367 = vst [vmem:[%s835_s2 + $0xb8] sm:$0xff] %v331_v7  ;;  %v312_v10 = vmax.f32 %v149_v8, 0.0  ;;  %v330_v11 = vmax.f32 %v239_v9, 0.0 }
  0xef   :  { %v479_v12 = vpop.f32.mrf.mxu0  ;;  %v506_v13 = vpop.f32.mrf.mxu1 }
  0xf0   :  { %348 = vst [vmem:[%s835_s2 + $0x20] sm:$0xff] %v312_v10  ;;  %366 = vst [vmem:[%s835_s2 + $0xb0] sm:$0xff] %v330_v11  ;;  %v315_v14 = vmax.f32 %v479_v12, 0.0  ;;  %v333_v15 = vmax.f32 %v506_v13, 0.0 }
  0xf1   :  { %v159_v16 = vpop.f32.mrf.mxu0  ;;  %v249_v17 = vpop.f32.mrf.mxu1 }
  0xf2   :  { %351 = vst [vmem:[%s835_s2 + $0x38] sm:$0xff] %v315_v14  ;;  %369 = vst [vmem:[%s835_s2 + $0xc8] sm:$0xff] %v333_v15  ;;  %v314_v18 = vmax.f32 %v159_v16, 0.0  ;;  %v332_v19 = vmax.f32 %v249_v17, 0.0 }
  0xf3   :  { %v482_v20 = vpop.f32.mrf.mxu0  ;;  %v509_v21 = vpop.f32.mrf.mxu1 }
  0xf4   :  { %350 = vst [vmem:[%s835_s2 + $0x30] sm:$0xff] %v314_v18  ;;  %368 = vst [vmem:[%s835_s2 + $0xc0] sm:$0xff] %v332_v19  ;;  %v317_v22 = vmax.f32 %v482_v20, 0.0  ;;  %v335_v23 = vmax.f32 %v509_v21, 0.0 }
  0xf5   :  { %v169_v24 = vpop.f32.mrf.mxu0  ;;  %v259_v25 = vpop.f32.mrf.mxu1 }
  0xf6   :  { %353 = vst [vmem:[%s835_s2 + $0x48] sm:$0xff] %v317_v22  ;;  %371 = vst [vmem:[%s835_s2 + $0xd8] sm:$0xff] %v335_v23  ;;  %v316_v26 = vmax.f32 %v169_v24, 0.0  ;;  %v334_v27 = vmax.f32 %v259_v25, 0.0 }
  0xf7   :  { %v485_v28 = vpop.f32.mrf.mxu0  ;;  %v512_v29 = vpop.f32.mrf.mxu1 }
  0xf8   :  { %352 = vst [vmem:[%s835_s2 + $0x40] sm:$0xff] %v316_v26  ;;  %370 = vst [vmem:[%s835_s2 + $0xd0] sm:$0xff] %v334_v27  ;;  %v319_v30 = vmax.f32 %v485_v28, 0.0  ;;  %v337_v31 = vmax.f32 %v512_v29, 0.0 }
  0xf9   :  { %v179_v32 = vpop.f32.mrf.mxu0  ;;  %v269_v33 = vpop.f32.mrf.mxu1 }
  0xfa   :  { %355 = vst [vmem:[%s835_s2 + $0x58] sm:$0xff] %v319_v30  ;;  %373 = vst [vmem:[%s835_s2 + $0xe8] sm:$0xff] %v337_v31  ;;  %v318_v34 = vmax.f32 %v179_v32, 0.0  ;;  %v336_v35 = vmax.f32 %v269_v33, 0.0 }
  0xfb   :  { %v488_v36 = vpop.f32.mrf.mxu0  ;;  %v515_v37 = vpop.f32.mrf.mxu1 }
  0xfc   :  { %354 = vst [vmem:[%s835_s2 + $0x50] sm:$0xff] %v318_v34  ;;  %372 = vst [vmem:[%s835_s2 + $0xe0] sm:$0xff] %v336_v35  ;;  %v321_v38 = vmax.f32 %v488_v36, 0.0  ;;  %v339_v39 = vmax.f32 %v515_v37, 0.0 }
  0xfd   :  { %v189_v40 = vpop.f32.mrf.mxu0  ;;  %v279_v41 = vpop.f32.mrf.mxu1 }
  0xfe   :  { %357 = vst [vmem:[%s835_s2 + $0x68] sm:$0xff] %v321_v38  ;;  %375 = vst [vmem:[%s835_s2 + $0xf8] sm:$0xff] %v339_v39  ;;  %v320_v42 = vmax.f32 %v189_v40, 0.0  ;;  %v338_v43 = vmax.f32 %v279_v41, 0.0 }
  0xff   :  { %v491_v44 = vpop.f32.mrf.mxu0  ;;  %v518_v45 = vpop.f32.mrf.mxu1 }
 0x100   :  { %356 = vst [vmem:[%s835_s2 + $0x60] sm:$0xff] %v320_v42  ;;  %374 = vst [vmem:[%s835_s2 + $0xf0] sm:$0xff] %v338_v43  ;;  %v323_v46 = vmax.f32 %v491_v44, 0.0  ;;  %v341_v47 = vmax.f32 %v518_v45, 0.0 }
 0x101   :  { %v199_v48 = vpop.f32.mrf.mxu0  ;;  %v289_v49 = vpop.f32.mrf.mxu1 }
 0x102   :  { %359 = vst [vmem:[%s835_s2 + $0x78] sm:$0xff] %v323_v46  ;;  %377 = vst [vmem:[%s835_s2 + $0x108] sm:$0xff] %v341_v47  ;;  %v322_v50 = vmax.f32 %v199_v48, 0.0  ;;  %v340_v51 = vmax.f32 %v289_v49, 0.0 }
 0x103   :  { %v494_v52 = vpop.f32.mrf.mxu0  ;;  %v521_v53 = vpop.f32.mrf.mxu1 }
 0x104   :  { %358 = vst [vmem:[%s835_s2 + $0x70] sm:$0xff] %v322_v50  ;;  %376 = vst [vmem:[%s835_s2 + $0x100] sm:$0xff] %v340_v51  ;;  %v325_v54 = vmax.f32 %v494_v52, 0.0  ;;  %v343_v55 = vmax.f32 %v521_v53, 0.0 }
 0x105   :  { %v209_v56 = vpop.f32.mrf.mxu0  ;;  %v299_v57 = vpop.f32.mrf.mxu1 }
 0x106   :  { %361 = vst [vmem:[%s835_s2 + $0x88] sm:$0xff] %v325_v54  ;;  %379 = vst [vmem:[%s835_s2 + $0x118] sm:$0xff] %v343_v55  ;;  %v324_v58 = vmax.f32 %v209_v56, 0.0  ;;  %v342_v59 = vmax.f32 %v299_v57, 0.0 }
 0x108   :  { %360 = vst [vmem:[%s835_s2 + $0x80] sm:$0xff] %v324_v58  ;;  %378 = vst [vmem:[%s835_s2 + $0x110] sm:$0xff] %v342_v59 }

// kernel: reverse.0
= control target key start
LH: loop header
LB: loop body
LE: loop exit
PB: predicated region body
PF: predicated region fallthrough
CT: control target
= control target key end

     0   :  { %v72_v3 = vlaneseq  ;;  %v65_v9 = vld [vmem:[#allocation0 + $0x7] ss:$-1 sm:$0xff]  ;;  %v79_v12 = vld [vmem:[#allocation0 + $0x17] ss:$-1 sm:$0xff]  ;;  %s331_s0 = inlined_call_operand.vmem [shape: f32[2,4,16,7], index: 0, kind: input, shape index: {}]   ;;  %s332_s1 = inlined_call_operand.vmem [shape: f32[2,4,16,7], index: 1, kind: output, shape index: {}]  }
   0x1   :  { %v45_v0 = vld [vmem:[%s331_s0] sm:$0xff]  ;;  %v47_v1 = vld [vmem:[%s331_s0 + $0x8] sm:$0xff]  ;;  %v49_v2 = vld [vmem:[%s331_s0 + $0x10] sm:$0xff]  ;;  %v66_v10 = vrot.slane %v65_v9, 1  ;;  %v80_v14 = vrot.slane %v79_v12, 1 }
   0x2   :  { %46 = vst [vmem:[#allocation0 + $0x8] sm:$0xff] %v45_v0  ;;  %48 = vst [vmem:[#allocation0 + $0x18] sm:$0xff] %v47_v1  ;;  %v51_v4 = vld [vmem:[%s331_s0 + $0x18] sm:$0xff]  ;;  %v53_v5 = vld [vmem:[%s331_s0 + $0x20] sm:$0xff]  ;;  %v73_v11 = vshrl.u32 %v72_v3, 7 }
   0x3   :  { %50 = vst [vmem:[#allocation0 + $0x28] sm:$0xff] %v49_v2  ;;  %v55_v6 = vld [vmem:[%s331_s0 + $0x28] sm:$0xff]  ;;  %52 = vst [vmem:[#allocation0 + $0x38] sm:$0xff] %v51_v4  ;;  %v57_v7 = vld [vmem:[%s331_s0 + $0x30] sm:$0xff] }
   0x4   :  { %54 = vst [vmem:[#allocation0 + $0x48] sm:$0xff] %v53_v5  ;;  %56 = vst [vmem:[#allocation0 + $0x58] sm:$0xff] %v55_v6  ;;  %v59_v8 = vld [vmem:[%s331_s0 + $0x38] sm:$0xff]  ;;  %v93_v13 = vld [vmem:[#allocation0 + $0x27] ss:$-1 sm:$0xff]  ;;  %vm74_vm0 = vcmp.lt.s32.totalorder %v73_v11, 7 }
   0x5   :  { %58 = vst [vmem:[#allocation0 + $0x68] sm:$0xff] %v57_v7  ;;  %60 = vst [vmem:[#allocation0 + $0x78] sm:$0xff] %v59_v8  ;;  %v94_v15 = vrot.slane %v93_v13, 1  ;;  %v107_v16 = vld [vmem:[#allocation0 + $0x37] ss:$-1 sm:$0xff] }
   0x6   :  { %67 = vst [vmem:[#allocation1] sm:$0xff] %v66_v10  ;;  %v108_v17 = vrot.slane %v107_v16, 1  ;;  %v121_v18 = vld [vmem:[#allocation0 + $0x47] ss:$-1 sm:$0xff]  ;;  %v135_v19 = vld [vmem:[#allocation0 + $0x57] ss:$-1 sm:$0xff] }
   0x7   :  { %81 = vst [vmem:[#allocation1 + $0x8] sm:$0xff] %v80_v14  ;;  %95 = vst [vmem:[#allocation1 + $0x10] sm:$0xff] %v94_v15  ;;  %v122_v20 = vrot.slane %v121_v18, 1  ;;  %v136_v21 = vrot.slane %v135_v19, 1  ;;  %v149_v22 = vld [vmem:[#allocation0 + $0x67] ss:$-1 sm:$0xff] }
   0x8   :  { %v163_v23 = vld [vmem:[#allocation0 + $0x77] ss:$-1 sm:$0xff]  ;;  %109 = vst [vmem:[#allocation1 + $0x18] sm:$0xff] %v108_v17  ;;  %v150_v24 = vrot.slane %v149_v22, 1 }
   0x9   :  { %v164_v25 = vrot.slane %v163_v23, 1  ;;  %v70_v26 = vld [vmem:[#allocation0 + $0xf] ss:$-1 sm:$0xff]  ;;  %v84_v27 = vld [vmem:[#allocation0 + $0x1f] ss:$-1 sm:$0xff]  ;;  %123 = vst [vmem:[#allocation1 + $0x20] sm:$0xff] %v122_v20 }
   0xa   :  { %v98_v28 = vld [vmem:[#allocation0 + $0x2f] ss:$-1 sm:$0xff]  ;;  %137 = vst [vmem:[#allocation1 + $0x28] sm:$0xff] %v136_v21  ;;  %v71_v29 = vrot.slane %v70_v26, 1  ;;  %v85_v30 = vrot.slane %v84_v27, 1  ;;  %151 = vst [vmem:[#allocation1 + $0x30] sm:$0xff] %v150_v24 }
   0xb   :  { %v99_v31 = vrot.slane %v98_v28, 1  ;;  %v112_v32 = vld [vmem:[#allocation0 + $0x3f] ss:$-1 sm:$0xff]  ;;  %165 = vst [vmem:[#allocation1 + $0x38] sm:$0xff] %v164_v25  ;;  %v126_v34 = vld [vmem:[#allocation0 + $0x4f] ss:$-1 sm:$0xff] }
   0xc   :  { %v113_v33 = vrot.slane %v112_v32, 1  ;;  %v140_v35 = vld [vmem:[#allocation0 + $0x5f] ss:$-1 sm:$0xff]  ;;  %75 = vst.msk [vmem:[#allocation1] sm:$0xff] %vm74_vm0, %v71_v29  ;;  %89 = vst.msk [vmem:[#allocation1 + $0x8] sm:$0xff] %vm74_vm0, %v85_v30  ;;  %v127_v36 = vrot.slane %v126_v34, 1 }
   0xd   :  { %103 = vst.msk [vmem:[#allocation1 + $0x10] sm:$0xff] %vm74_vm0, %v99_v31  ;;  %v141_v37 = vrot.slane %v140_v35, 1  ;;  %v154_v38 = vld [vmem:[#allocation0 + $0x6f] ss:$-1 sm:$0xff]  ;;  %v168_v39 = vld [vmem:[#allocation0 + $0x7f] ss:$-1 sm:$0xff] }
   0xe   :  { %117 = vst.msk [vmem:[#allocation1 + $0x18] sm:$0xff] %vm74_vm0, %v113_v33  ;;  %v155_v40 = vrot.slane %v154_v38, 1  ;;  %v169_v41 = vrot.slane %v168_v39, 1  ;;  %131 = vst.msk [vmem:[#allocation1 + $0x20] sm:$0xff] %vm74_vm0, %v127_v36 }
   0xf   :  { %145 = vst.msk [vmem:[#allocation1 + $0x28] sm:$0xff] %vm74_vm0, %v141_v37 }
  0x10   :  { %159 = vst.msk [vmem:[#allocation1 + $0x30] sm:$0xff] %vm74_vm0, %v155_v40  ;;  %173 = vst.msk [vmem:[#allocation1 + $0x38] sm:$0xff] %vm74_vm0, %v169_v41 }
  0x13   :  { %v216_v42 = vld [vmem:[#allocation1] sm:$0xff]  ;;  %v218_v43 = vld [vmem:[#allocation1 + $0x8] sm:$0xff] }
  0x14   :  { %v220_v44 = vld [vmem:[#allocation1 + $0x10] sm:$0xff]  ;;  %217 = vst [vmem:[%s332_s1] sm:$0xff] %v216_v42  ;;  %219 = vst [vmem:[%s332_s1 + $0x8] sm:$0xff] %v218_v43 }
  0x15   :  { %221 = vst [vmem:[%s332_s1 + $0x10] sm:$0xff] %v220_v44  ;;  %v222_v45 = vld [vmem:[#allocation1 + $0x18] sm:$0xff]  ;;  %v224_v46 = vld [vmem:[#allocation1 + $0x20] sm:$0xff] }
  0x16   :  { %223 = vst [vmem:[%s332_s1 + $0x18] sm:$0xff] %v222_v45  ;;  %v226_v47 = vld [vmem:[#allocation1 + $0x28] sm:$0xff]  ;;  %225 = vst [vmem:[%s332_s1 + $0x20] sm:$0xff] %v224_v46 }
  0x17   :  { %227 = vst [vmem:[%s332_s1 + $0x28] sm:$0xff] %v226_v47  ;;  %v228_v48 = vld [vmem:[#allocation1 + $0x30] sm:$0xff]  ;;  %v230_v49 = vld [vmem:[#allocation1 + $0x38] sm:$0xff] }
  0x18   :  { %229 = vst [vmem:[%s332_s1 + $0x30] sm:$0xff] %v228_v48  ;;  %231 = vst [vmem:[%s332_s1 + $0x38] sm:$0xff] %v230_v49 }

</bundles_post_ra>
